<compile_context>
chip_gen: v7x
topology: tpu7x:2x2x1
jax: 0.10.0
libtpu: 0.0.40
codegen_flags: <defaults>
</compile_context>

<pallas_src>
import functools
import math

import jax
import jax.numpy as jnp
from jax.experimental import pallas as pl
from jax.experimental.pallas import tpu as pltpu


def _round_up(x, n):
    return ((x + n - 1) // n) * n


def _cdiv(a, b):
    return (a + b - 1) // b


def _vmem_budget_bytes():
    """0.75 * physical per-core VMEM; conservative 48 MiB fallback."""
    cap = 64 * 1024 * 1024
    try:
        info = pltpu.get_tpu_info()
        cap = int(getattr(info, "vmem_capacity_bytes", cap))
    except Exception:
        pass
    return int(0.75 * cap)


def _resident_spec(shape):
    """Grid-invariant input: constant index_map; single-buffered if supported."""
    index_map = lambda i: (0,) * len(shape)
    if hasattr(pl, "Buffered"):
        try:
            return pl.BlockSpec(shape, index_map, pipeline_mode=pl.Buffered(1))
        except TypeError:
            pass  # older JAX without pipeline_mode on BlockSpec
    return pl.BlockSpec(shape, index_map)


# --------------------------------------------------------------------------
# Kernels
# --------------------------------------------------------------------------

def _qkv_fused_kernel(x_ref, w_ref, b_ref, y_ref):
    # x_ref: (tm, dim) in x's original dtype -- cast in-kernel (VPU is free
    #        here; avoids an extra XLA convert pass over x in HBM).
    # w_ref: (dim, out_dim) compute dtype, grid-invariant.
    # b_ref: (1, out_dim) f32, grid-invariant.
    # y_ref: (tm, out_dim) output tile (full lane width of the array).
    x = x_ref[...].astype(w_ref.dtype)
    y = jnp.dot(x, w_ref[...], preferred_element_type=jnp.float32) + b_ref[...]
    y_ref[...] = y.astype(y_ref.dtype)


def _qkv_split_kernel(x_ref, w_ref, b_ref, q_ref, k_ref, v_ref):
    # Same fused MXU matmul (full N width), then 128-lane-aligned slices of
    # the f32 result written to three lane-dense outputs.
    x = x_ref[...].astype(w_ref.dtype)
    y = jnp.dot(x, w_ref[...], preferred_element_type=jnp.float32) + b_ref[...]
    nq = q_ref.shape[-1]
    q_ref[...] = y[:, :nq].astype(q_ref.dtype)
    k_ref[...] = y[:, nq:2 * nq].astype(k_ref.dtype)
    v_ref[...] = y[:, 2 * nq:].astype(v_ref.dtype)


# --------------------------------------------------------------------------
# Wrapper
# --------------------------------------------------------------------------

@functools.partial(
    jax.jit,
    static_argnames=("qk_dim", "dim", "block_m", "use_bf16", "out_dtype"))
def qkv_linear(x, w, b, *, qk_dim, dim, block_m=1024, use_bf16=True,
               out_dtype=None):
    """Pallas implementation of QKVLinear.forward.

    x : (..., dim) float array (e.g. (B, H, W, dim))
    w : (dim, 2*qk_dim + dim)   (= torch Linear weight transposed)
    b : (2*qk_dim + dim,)
    returns (q, k, v) with trailing dims qk_dim, qk_dim, dim.
    Outputs default to the compute dtype (bf16 on the MXU path); pass
    out_dtype=jnp.float32 (and/or use_bf16=False) for f32 semantics.
    """
    out_dim = 2 * qk_dim + dim
    assert w.shape == (dim, out_dim), (w.shape, (dim, out_dim))
    assert b.shape == (out_dim,), (b.shape, out_dim)

    lead_shape = x.shape[:-1]
    m = math.prod(lead_shape) if lead_shape else 1

    # Compute / output dtypes.
    if use_bf16 and (x.dtype == jnp.float32 or x.dtype == jnp.bfloat16):
        compute_dtype = jnp.bfloat16
    else:
        compute_dtype = x.dtype
    out_dt = jnp.dtype(out_dtype) if out_dtype is not None \
        else jnp.dtype(compute_dtype)

    x2 = x.reshape(m, dim)                        # NO dtype change here
    w_c = w.astype(compute_dtype)                 # no-op if pre-converted
    b_c = b.astype(jnp.float32).reshape(1, out_dim)

    # ---- tile size / VMEM derivation (per-generation budget) -------------
    vmem_budget = _vmem_budget_bytes()
    x_b = jnp.dtype(x.dtype).itemsize
    w_b = jnp.dtype(compute_dtype).itemsize
    o_b = out_dt.itemsize
    # Conservative: assume W/bias still get 2 buffers even if Buffered(1).
    fixed = 2 * dim * out_dim * w_b + 2 * 8 * _round_up(out_dim, 128) * 4
    per_row = (2 * dim * x_b          # x tile, double-buffered
               + dim * w_b            # in-kernel bf16 copy of x
               + 2 * out_dim * o_b    # output tile(s), double-buffered
               + out_dim * 4)         # f32 matmul result
    slack = 4 * 1024 * 1024

    m_pad = _round_up(m, 16)
    tm = min(block_m, m_pad)
    # >= 4 grid steps when possible: shards across v7x's 2 TCs and keeps
    # DMA/compute pipelining alive on all generations.
    tm = min(tm, max(16, _round_up(_cdiv(m_pad, 4), 16)))
    avail = vmem_budget - fixed - slack
    assert avail >= 16 * per_row, (
        "QKVLinear weight slab too large for the resident-W kernel "
        f"(dim={dim}, out_dim={out_dim}); add an N/K grid axis.")
    tm = min(tm, max(16, (avail // per_row) // 16 * 16))
    grid_m = _cdiv(m, tm)

    vmem_limit = int(min(vmem_budget,
                         max(32 * 1024 * 1024, fixed + tm * per_row + slack)))

    x_spec = pl.BlockSpec((tm, dim), lambda i: (i, 0))
    w_spec = _resident_spec((dim, out_dim))
    b_spec = _resident_spec((1, out_dim))
    compiler_params = pltpu.CompilerParams(
        dimension_semantics=("parallel",),
        vmem_limit_bytes=vmem_limit,
    )

    # Lane-dense three-output path only when every split boundary / output
    # width sits on a 128-lane boundary; otherwise emit one fused output.
    split_outputs = (qk_dim % 128 == 0) and (dim % 128 == 0)

    if split_outputs:
        q, k, v = pl.pallas_call(
            _qkv_split_kernel,
            out_shape=(jax.ShapeDtypeStruct((m, qk_dim), out_dt),
                       jax.ShapeDtypeStruct((m, qk_dim), out_dt),
                       jax.ShapeDtypeStruct((m, dim), out_dt)),
            grid=(grid_m,),
            in_specs=[x_spec, w_spec, b_spec],
            out_specs=(pl.BlockSpec((tm, qk_dim), lambda i: (i, 0)),
                       pl.BlockSpec((tm, qk_dim), lambda i: (i, 0)),
                       pl.BlockSpec((tm, dim), lambda i: (i, 0))),
            compiler_params=compiler_params,
        )(x2, w_c, b_c)
    else:
        y = pl.pallas_call(
            _qkv_fused_kernel,
            out_shape=jax.ShapeDtypeStruct((m, out_dim), out_dt),
            grid=(grid_m,),
            in_specs=[x_spec, w_spec, b_spec],
            out_specs=pl.BlockSpec((tm, out_dim), lambda i: (i, 0)),
            compiler_params=compiler_params,
        )(x2, w_c, b_c)
        # Sub-128 lane splits are left to XLA (they fuse into consumers);
        # doing them as separate kernel outputs would force masked vst.msk
        # partial stores on every tile.
        q = y[:, :qk_dim]
        k = y[:, qk_dim:2 * qk_dim]
        v = y[:, 2 * qk_dim:]

    q = q.reshape(*lead_shape, qk_dim)
    k = k.reshape(*lead_shape, qk_dim)
    v = v.reshape(*lead_shape, dim)
    return q, k, v


# --------------------------------------------------------------------------
# Parameter helpers
# --------------------------------------------------------------------------

def init_qkv_params(key, dim, qk_dim, dtype=jnp.float32):
    """Deterministic synthetic init matching nn.Linear(dim, 2*qk_dim+dim)."""
    out_dim = 2 * qk_dim + dim
    kw, kb = jax.random.split(key)
    bound = 1.0 / math.sqrt(dim)
    # torch weight is (out_dim, dim); we store its transpose (dim, out_dim).
    w = jax.random.uniform(kw, (dim, out_dim), dtype, -bound, bound)
    b = jax.random.uniform(kb, (out_dim,), dtype, -bound, bound)
    return w, b


def prepare_qkv_params(w, b, use_bf16=True):
    """One-time (init-time) dtype conversion so the hot path has no casts."""
    w_c = w.astype(jnp.bfloat16) if use_bf16 else w
    return w_c, b.astype(jnp.float32)


# --------------------------------------------------------------------------
# Self-test
# --------------------------------------------------------------------------

if __name__ == "__main__":
    key = jax.random.PRNGKey(0)
    k_x, k_p, k_x2, k_p2 = jax.random.split(key, 4)

    def close(a, bref, atol, rtol):
        return jnp.allclose(a.astype(jnp.float32), bref.astype(jnp.float32),
                            atol=atol, rtol=rtol)

    # --- default path: bf16 MXU + bf16 outputs, fused output (dims < 128) ---
    B, H, W = 2, 8, 8
    dim, qk_dim = 32, 32
    out_dim = 2 * qk_dim + dim
    x = jax.random.normal(k_x, (B, H, W, dim), jnp.float32)
    w, b = init_qkv_params(k_p, dim, qk_dim)
    w_p, b_p = prepare_qkv_params(w, b)           # hoisted one-time conversion

    q, k_out, v = qkv_linear(x, w_p, b_p, qk_dim=qk_dim, dim=dim)
    jax.block_until_ready((q, k_out, v))
    assert q.shape == (B, H, W, qk_dim) and q.dtype == jnp.bfloat16
    assert k_out.shape == (B, H, W, qk_dim)
    assert v.shape == (B, H, W, dim)

    y_bf = (jnp.dot(x.reshape(-1, dim).astype(jnp.bfloat16), w_p,
                    preferred_element_type=jnp.float32)
            + b_p).astype(jnp.bfloat16).reshape(B, H, W, out_dim)
    assert close(q, y_bf[..., :qk_dim], 2e-2, 2e-2)
    assert close(k_out, y_bf[..., qk_dim:2 * qk_dim], 2e-2, 2e-2)
    assert close(v, y_bf[..., 2 * qk_dim:], 2e-2, 2e-2)

    # --- opt-in f32 path (debug / training-exact) ---------------------------
    q32, k32, v32 = qkv_linear(x, w, b, qk_dim=qk_dim, dim=dim,
                               use_bf16=False, out_dtype=jnp.float32)
    jax.block_until_ready((q32, k32, v32))
    assert q32.dtype == jnp.float32
    y32 = (jnp.dot(x.reshape(-1, dim), w, preferred_element_type=jnp.float32,
                   precision=jax.lax.Precision.HIGHEST)
           + b).reshape(B, H, W, out_dim)
    assert close(q32, y32[..., :qk_dim], 2e-3, 2e-3)
    assert close(k32, y32[..., qk_dim:2 * qk_dim], 2e-3, 2e-3)
    assert close(v32, y32[..., 2 * qk_dim:], 2e-3, 2e-3)

    # --- 128-aligned dims: exercises the lane-dense three-output kernel -----
    dim2 = qk_dim2 = 128
    x2 = jax.random.normal(k_x2, (B, H, W, dim2), jnp.float32)
    w2, b2 = init_qkv_params(k_p2, dim2, qk_dim2)
    w2p, b2p = prepare_qkv_params(w2, b2)
    q2, k2, v2 = qkv_linear(x2, w2p, b2p, qk_dim=qk_dim2, dim=dim2)
    jax.block_until_ready((q2, k2, v2))
    y2 = (jnp.dot(x2.reshape(-1, dim2).astype(jnp.bfloat16), w2p,
                  preferred_element_type=jnp.float32)
          + b2p).astype(jnp.bfloat16).reshape(B, H, W, 3 * dim2)
    assert q2.shape == (B, H, W, qk_dim2)
    assert close(q2, y2[..., :qk_dim2], 2e-2, 2e-2)
    assert close(k2, y2[..., qk_dim2:2 * qk_dim2], 2e-2, 2e-2)
    assert close(v2, y2[..., 2 * qk_dim2:], 2e-2, 2e-2)

    print("KERNEL_OK")
</pallas_src>

<mosaic_0001>
module attributes {stable_mosaic.version = 11 : i64} {
  func.func @_qkv_fused_kernel(%arg0: i32, %arg1: memref<32x32xf32, #tpu.memory_space<vmem>>, %arg2: memref<32x96xbf16, #tpu.memory_space<vmem>>, %arg3: memref<1x96xf32, #tpu.memory_space<vmem>>, %arg4: memref<32x96xbf16, #tpu.memory_space<vmem>>) attributes {dimension_semantics = [#tpu.dimension_semantics<parallel>], iteration_bounds = array<i64: 4>, scalar_prefetch = 0 : i64, scratch_operands = 0 : i64, tpu.core_type = #tpu.core_type<tc>, window_params = [{transform_indices = @transform_0, window_bounds = array<i64: 32, 32>}, {pipeline_mode = #tpu.pipeline_mode<synchronous>, transform_indices = @transform_1, window_bounds = array<i64: 32, 96>}, {pipeline_mode = #tpu.pipeline_mode<synchronous>, transform_indices = @transform_2, window_bounds = array<i64: 1, 96>}, {transform_indices = @transform_3, window_bounds = array<i64: 32, 96>}]} {
    %c0 = arith.constant 0 : index
    %c0_0 = arith.constant 0 : index
    %0 = vector.load %arg1[%c0, %c0_0] : memref<32x32xf32, #tpu.memory_space<vmem>>, vector<32x32xf32>
    %1 = arith.truncf %0 : vector<32x32xf32> to vector<32x32xbf16>
    %c0_1 = arith.constant 0 : index
    %c0_2 = arith.constant 0 : index
    %2 = vector.load %arg2[%c0_1, %c0_2] : memref<32x96xbf16, #tpu.memory_space<vmem>>, vector<32x96xbf16>
    %cst = arith.constant dense<0.000000e+00> : vector<32x96xf32>
    %3 = tpu.matmul %1, %2, %cst {dimension_numbers = #tpu.dot_dimension_numbers<[1], [0], [0], [1], [0, 0, 1, 1], [], []>} : vector<32x32xbf16>, vector<32x96xbf16>, vector<32x96xf32> -> vector<32x96xf32>
    %c0_3 = arith.constant 0 : index
    %c0_4 = arith.constant 0 : index
    %4 = vector.load %arg3[%c0_3, %c0_4] : memref<1x96xf32, #tpu.memory_space<vmem>>, vector<1x96xf32>
    %5 = vector.broadcast %4 : vector<1x96xf32> to vector<32x96xf32>
    %6 = arith.addf %3, %5 : vector<32x96xf32>
    %7 = arith.truncf %6 : vector<32x96xf32> to vector<32x96xbf16>
    %c0_5 = arith.constant 0 : index
    %c0_6 = arith.constant 0 : index
    %8 = vector.load %arg4[%c0_5, %c0_6] : memref<32x96xbf16, #tpu.memory_space<vmem>>, vector<32x96xbf16>
    tpu.vector_store %arg4[%c0_5, %c0_6], %7 {strides = array<i32>} : memref<32x96xbf16, #tpu.memory_space<vmem>>, vector<32x96xbf16>,
    return
  }
  func.func @transform_0(%arg0: i32) -> (i32, i32) {
    %c0_i32 = arith.constant 0 : i32
    %c0_i32_0 = arith.constant 0 : i32
    return %arg0, %c0_i32 : i32, i32
  }
  func.func @transform_1(%arg0: i32) -> (i32, i32) {
    %c0_i32 = arith.constant 0 : i32
    %c0_i32_0 = arith.constant 0 : i32
    %c0_i32_1 = arith.constant 0 : i32
    return %c0_i32, %c0_i32_0 : i32, i32
  }
  func.func @transform_2(%arg0: i32) -> (i32, i32) {
    %c0_i32 = arith.constant 0 : i32
    %c0_i32_0 = arith.constant 0 : i32
    %c0_i32_1 = arith.constant 0 : i32
    return %c0_i32, %c0_i32_0 : i32, i32
  }
  func.func @transform_3(%arg0: i32) -> (i32, i32) {
    %c0_i32 = arith.constant 0 : i32
    %c0_i32_0 = arith.constant 0 : i32
    return %arg0, %c0_i32 : i32, i32
  }
}

</mosaic_0001>

<bundles_post_ra>
// kernel: qkv_linear.1
= control target key start
LH: loop header
LB: loop body
LE: loop exit
PB: predicated region body
PF: predicated region fallthrough
CT: control target
= control target key end

     0   :  { %8 = vsyncpa [#allocation3], 0  ;;  %s761_s0 = inlined_call_operand.hbm [shape: f32[128,32], index: 0, kind: input, shape index: {}]   ;;  %s762_s1 = inlined_call_operand.hbm [shape: bf16[32,96], index: 1, kind: input, shape index: {}]   ;;  %s763_s2 = inlined_call_operand.vmem [shape: f32[1,96], index: 2, kind: input, shape index: {}]   ;;  %s764_s3 = inlined_call_operand.vmem [shape: bf16[128,96], index: 3, kind: output, shape index: {}]  }
   0x1   :  { %10 = vsyncpa [#allocation3 + $0x1], 0 }
   0x2   :  { %11 = vsyncpa [#allocation5], 0  ;;  %s613_s12 = smov 0   ;;  %s615_s13 = smov 0  }
   0x3   :  { %s617_s14 = smov 0   ;;  %s619_s15 = smov 0  }
   0x4 LB: > { %s392_s16 = sadd.s32 4294967295, %s585_s15   ;;  %p37_p0 = scmp.ne.s32.totalorder %s577_s13, %s573_s12  ;;  %s585_s15 = sphi %s619_s15, %s780_s15   ;;  %s581_s14 = sphi %s617_s14, %s779_s14   ;;  %s577_s13 = sphi %s615_s13, %s778_s13   ;;  %s573_s12 = sphi %s613_s12, %s777_s12  }
   0x5   : > { %p635_p1 = scmp.eq.s32.totalorder %s392_s16, 0  ;;  %p394_p2 = scmp.ge.s32.totalorder %s585_s15, 1 }
   0x6   : > { %p116_p3 = scmp.lt.s32.totalorder %s585_s15, 5  ;;  %s587_s20 = smov [#allocation4]  }
   0x7   : > { %s769_s17 = scalar_select %p635_p1, 1, 0 }
   0x8   : > { %p643_p4 = por %p635_p1, %p37_p0  ;;  %p647_p5 = pnand %p394_p2, %p116_p3 }
   0x9   : > { %s128_s21 = sshll.u32 %s587_s20, 4  ;;  %s660_s23 = sadd.s32 1, %s585_s15   ;;  %s129_s21 = int_to_ptr.vmem [resolvable:$true] %s128_s21 }
   0xa   : > { %s770_s18 = scalar_select %p643_p4, 1, 0 }
   0xb   : > { %s771_s19 = scalar_select %p647_p5, 1, 0 }
   0xc   : > { %p439_p6 = pneg %p647_p5  ;;  %s24_s24 = sadd.s32 1, %s581_s14 }
   0xd   : > { %s21_s25 = ssub.s32 %s585_s15, %s660_s23  ;;  %s489_s28 = scalar_lea.hbm %s762_s1, 256 }
   0xe   : > { %p655_p7 = pnand %p439_p6, %p635_p1  ;;  %p490_p8 = scmp.ne.s32.totalorder %s762_s1, %s489_s28 }
   0xf   : > { %p496_p12 = scmp.lt.u32.totalorder %s489_s28, %s762_s1 }
  0x10   : > { %p491_p9 = pneg %p655_p7 }
  0x12   : > { %p492_p10 = pnand %p491_p9, %p490_p8 }
  0x14   : > { %p493_p11 = pneg %p492_p10 }
  0x16   : > { %p498_p13 = pnand %p496_p12, %p493_p11 }
  0x18   : > { %501 = shalt.err (!%p498_p13)
}
  0x19   : > { %s502_s6 = scalar_lea.vmem %s129_s21, 256  ;;  %p510_p6 = scmp.lt.s32.totalorder %s129_s21, %s129_s21 }
  0x1a   : > { %p503_p0 = scmp.ne.s32.totalorder %s129_s21, %s502_s6  ;;  %p511_p1 = scmp.lt.s32.totalorder %s502_s6, %s502_s6 }
  0x1c   : > { %p505_p2 = pnand %p503_p0, %p491_p9  ;;  %p512_p4 = por %p511_p1, %p510_p6 }
  0x1e   : > { %p506_p3 = pneg %p505_p2 }
  0x20   : > { %p513_p5 = pnand %p512_p4, %p506_p3 }
  0x22   : > { %516 = shalt.err (!%p513_p5)
}
  0x23   : > { %s588_s7 = smov 64   ;;  %s589_s8 = smov 4  }
  0x24   : > { %442 = dma.hbm_to_vmem [thread:$0]  (!%p655_p7), %s762_s1, 256, %s129_s21, [#allocation5], %s588_s7, %s588_s7, %s589_s8  }
  0x25   : > { %p22_p8 = scmp.eq.s32.totalorder %s21_s25, 0  ;;  %p31_p9 = scmp.ne.s32.totalorder %s581_s14, %s577_s13 }
  0x26   : > { %p32_p1 = scmp.eq.s32.totalorder %s585_s15, 0  ;;  %p448_p4 = scmp.lt.s32.totalorder %s585_s15, 4 }
  0x27   : > { %s686_s11 = scalar_select %p22_p8, %s581_s14, %s24_s24  }
  0x28   : > { %p33_p5 = por %p32_p1, %p31_p9  ;;  %s145_s12 = sand.u32 1, %s581_s14  }
  0x29   : > { %s397_s20 = sshll.u32 %s145_s12, 5  ;;  %s416_s26 = sshll.u32 %s585_s15, 9 }
  0x2a   : > { %s693_s29 = scalar_lea.hbm %s761_s0, %s416_s26  ;;  %s149_s21 = scalar_lea.vmem [#allocation2], %s397_s20 }
  0x2b   : > { %s156_s22 = sshll.u32 %s149_s21, 4  ;;  %p697_p7 = pnand %p448_p4, %p33_p5  ;;  %s695_s22 = int_to_ptr.vmem [resolvable:$true] %s156_s22 }
  0x2c   : > { %s701_s25 = scalar_lea.sflag [#allocation3], %s145_s12  ;;  %s517_s30 = scalar_lea.hbm %s693_s29, 512 }
  0x2d   : > { %p518_p10 = scmp.ne.s32.totalorder %s693_s29, %s517_s30  ;;  %p519_p11 = pneg %p697_p7 }
  0x2e   : > { %s522_s6 = scalar_lea.hbm %s761_s0, 2048  ;;  %p523_p0 = scmp.lt.u32.totalorder %s693_s29, %s761_s0 }
  0x2f   : > { %p520_p12 = pnand %p519_p11, %p518_p10  ;;  %p524_p2 = scmp.lt.u32.totalorder %s522_s6, %s517_s30 }
  0x30   : > { %p526_p6 = scmp.lt.u32.totalorder %s517_s30, %s693_s29 }
  0x31   : > { %p521_p13 = pneg %p520_p12  ;;  %p525_p3 = por %p524_p2, %p523_p0 }
  0x33   : > { %p527_p8 = por %p526_p6, %p525_p3 }
  0x35   : > { %p528_p9 = pnand %p527_p8, %p521_p13 }
  0x37   : > { %531 = shalt.err (!%p528_p9)
}
  0x38   : > { %s532_s9 = scalar_lea.vmem %s695_s22, 512  ;;  %s590_s10 = smov [#allocation2]  }
  0x39   : > { %p533_p1 = scmp.ne.s32.totalorder %s695_s22, %s532_s9  ;;  %s537_s12 = sshll.u32 %s590_s10, 4  ;;  %s538_s12 = int_to_ptr.vmem [resolvable:$false] %s537_s12 }
  0x3a   : > { %s539_s20 = scalar_lea.vmem %s538_s12, 1024  ;;  %p540_p10 = scmp.lt.s32.totalorder %s695_s22, %s538_s12 }
  0x3b   : > { %p535_p4 = pnand %p533_p1, %p519_p11  ;;  %p541_p12 = scmp.lt.s32.totalorder %s539_s20, %s532_s9 }
  0x3d   : > { %p536_p5 = pneg %p535_p4  ;;  %p542_p0 = por %p541_p12, %p540_p10 }
  0x3f   : > { %p543_p2 = pnand %p542_p0, %p536_p5 }
  0x41   : > { %546 = shalt.err (!%p543_p2)
}
  0x42   : > { %s591_s26 = smov 128   ;;  %s592_s27 = smov 8  }
  0x43   : > { %446 = dma.hbm_to_vmem [thread:$0]  (!%p697_p7), %s693_s29, 512, %s695_s22, %s701_s25, %s591_s26, %s591_s26, %s592_s27  }
  0x44   : > { %p774_p11 = scmp.ne.s32.totalorder %s771_s19, 0 }
  0x45   : > { %s170_s28 = sand.u32 (!%p774_p11), 1, %s577_s13   ;;  %p775_p13 = scmp.ne.s32.totalorder (!%p774_p11), %s770_s18, 0 }
  0x46   : > { %168 = sbr.rel (%p774_p11) target bundleno = 310 (0x136), region = 32  ;;  %s401_s21 = sshll.u32 (!%p774_p11), %s170_s28, 5 }
  0x47   : > { %s171_s30 = scalar_lea.sflag (!%p774_p11), [#allocation3], %s170_s28  ;;  %s174_s4 = scalar_lea.vmem (!%p774_p11), [#allocation2], %s401_s21 }
  0x4d   : > { %564 = dma.done.wait (%p775_p13), %s171_s30, 512  }
  0x4e   : > { %566 = vsyncadd (%p775_p13), %s171_s30, 4294966784  ;;  %p776_p3 = scmp.ne.s32.totalorder %s769_s17, 0 }
  0x50   : > { %568 = dma.done.wait (%p776_p3), [#allocation5], 256  }
  0x51   : > { %570 = vsyncadd (%p776_p3), [#allocation5], 4294967040  ;;  %v487_v0 = vld [vmem:[#allocation4] sm:$0xff]   ;;  %v488_v1 = vld [vmem:[#allocation4 + $0x8] sm:$0xff]   ;;  %vm238_vm0 = vcmask 261120   ;;  %s403_s18 = sshll.u32 %s392_s16, 2 }
  0x52   : > { %425 = vmatprep.subr.bf16.mxu0 %v487_v0  ;;  %v209_v2 = vld [vmem:[%s174_s4] sm:$0xff]  ;;  %v210_v3 = vld [vmem:[%s174_s4 + $0x8] sm:$0xff]  ;;  %v211_v5 = vld [vmem:[%s174_s4 + $0x10] sm:$0xff]  ;;  %p203_p7 = scmp.lt.s32.totalorder %s403_s18, 15  ;;  %vm310_vm1 = vcmask 781312  }
  0x53   : > { %426 = vmatpush3.bf16.msra.mxu0 %v487_v0  ;;  %v213_v4 = vpack.c.bf16 %v210_v3, %v209_v2  ;;  %v212_v6 = vld [vmem:[%s174_s4 + $0x18] sm:$0xff]  ;;  %v405_v8 = vld [vmem:[%s763_s2] ss:$0 sm:$0xff] }
  0x54   : > { %427 = vmatprep.subr.bf16.mxu0 %v488_v1  ;;  %v214_v7 = vpack.c.bf16 %v212_v6, %v211_v5  ;;  %s782_s18 = smov (!%p203_p7, %s403_s18), 15 }
  0x55   : > { %429 = vmatprep.mubr.msk.bf16.mxu0 %vm238_vm0, %v213_v4  ;;  %s404_s29 = sshll.u32 %s782_s18, 2 }
  0x56   : > { %s206_s25 = scalar_lea.vmem %s764_s3, %s404_s29 }
  0x57   : > { %428 = vmatpush3.bf16.msra.mxu0 %v488_v1 }
  0x5a   : > { %430 = vmatmul.mubr.msk.bf16.vlgmr.msra.gmra.mrb[0].mxu0 %vm238_vm0, %v214_v7 }
 0x12d   : > { %v431_v9 = vpop.f32.mrb[0].mxu0 }
 0x12e   : > { %v288_v10 = vadd.f32 %v431_v9, %v405_v8  ;;  %v279_v11 = vpop.f32.mrb[1].mxu0 }
 0x12f   : > { %v280_v12 = vadd.f32 %v405_v8, %v279_v11  ;;  %v432_v13 = vpop.f32.mrb[2].mxu0 }
 0x130   : > { %v419_v14 = vpack.c.bf16 %v288_v10, %v288_v10  ;;  %v291_v15 = vadd.f32 %v432_v13, %v405_v8  ;;  %v282_v16 = vpop.f32.mrb[3].mxu0 }
 0x131   : > { %v417_v17 = vpack.c.bf16 %v280_v12, %v280_v12  ;;  %v283_v18 = vadd.f32 %v405_v8, %v282_v16 }
 0x132   : > { %313 = vst.msk [vmem:[%s206_s25 + $0x8] sm:$0xf] %vm310_vm1, %v419_v14  ;;  %v420_v19 = vpack.c.bf16 %v291_v15, %v291_v15 }
 0x133   : > { %311 = vst.msk [vmem:[%s206_s25] sm:$0xf] %vm310_vm1, %v417_v17  ;;  %v418_v20 = vpack.c.bf16 %v283_v18, %v283_v18 }
 0x134   : > { %314 = vst.msk [vmem:[%s206_s25 + $0xc] sm:$0xf] %vm310_vm1, %v420_v19 }
 0x135   : > { %312 = vst.msk [vmem:[%s206_s25 + $0x4] sm:$0xf] %vm310_vm1, %v418_v20 }
 0x136 PF: > { %p14_p6 = scmp.ge.s32.totalorder %s660_s23, 6   ;;  %s777_s12 = smov %s577_s13 }
 0x137   : > { %s778_s13 = smov %s581_s14  ;;  %s779_s14 = smov %s686_s11 }
 0x138   : > { %s780_s15 = smov %s660_s23  ;;  %16 = sbr.rel (!%p14_p6) target bundleno = 4 (0x4), region = 76 }
 0x13f   :  { %337 = vsyncpa [#allocation3], 1 }
 0x140   :  { %339 = vsyncpa [#allocation3 + $0x1], 1 }
 0x141   :  { %340 = vsyncpa [#allocation5], 1 }

</bundles_post_ra>
